<compile_context>
chip_gen: v5e
topology: v5e:2x2
jax: 0.10.0
libtpu: 0.0.40
codegen_flags: <defaults>
</compile_context>

<pallas_src>
import functools

import numpy as np
import jax
import jax.numpy as jnp
from jax.experimental import pallas as pl
from jax.experimental.pallas import tpu as pltpu


# -----------------------------------------------------------------------------
# Deterministic parameter setup: generate_anchors (py-faster-rcnn style),
# used by the module's __init__.
# -----------------------------------------------------------------------------
def _whctrs(anchor):
    w = anchor[2] - anchor[0] + 1
    h = anchor[3] - anchor[1] + 1
    x_ctr = anchor[0] + 0.5 * (w - 1)
    y_ctr = anchor[1] + 0.5 * (h - 1)
    return w, h, x_ctr, y_ctr


def _mkanchors(ws, hs, x_ctr, y_ctr):
    ws = ws[:, None]
    hs = hs[:, None]
    return np.hstack((x_ctr - 0.5 * (ws - 1), y_ctr - 0.5 * (hs - 1),
                      x_ctr + 0.5 * (ws - 1), y_ctr + 0.5 * (hs - 1)))


def _ratio_enum(anchor, ratios):
    w, h, x_ctr, y_ctr = _whctrs(anchor)
    size = w * h
    size_ratios = size / ratios
    ws = np.round(np.sqrt(size_ratios))
    hs = np.round(ws * ratios)
    return _mkanchors(ws, hs, x_ctr, y_ctr)


def _scale_enum(anchor, scales):
    w, h, x_ctr, y_ctr = _whctrs(anchor)
    ws = w * scales
    hs = h * scales
    return _mkanchors(ws, hs, x_ctr, y_ctr)


def generate_anchors(base_size=16, ratios=np.array([0.5, 1, 2]),
                     scales=2 ** np.arange(3, 6)):
    base_anchor = np.array([1, 1, base_size, base_size], dtype=np.float64) - 1
    ratio_anchors = _ratio_enum(base_anchor, np.asarray(ratios, dtype=np.float64))
    anchors = np.vstack([_scale_enum(ratio_anchors[i, :], np.asarray(scales, dtype=np.float64))
                         for i in range(ratio_anchors.shape[0])])
    return anchors.astype(np.float32)


# config constants (cfg['TRAIN'] in the reference)
RPN_MIN_SIZE = 8.0
PRE_NMS_TOPN = 100
POST_NMS_TOPN = 0       # <= 0 means "no truncation" in the reference
NMS_THRESH = 0.3


def _round_up(x, m):
    return ((x + m - 1) // m) * m


# -----------------------------------------------------------------------------
# Pallas kernel.
#   params_ref : (3,)  SMEM  [im_h, im_w, min_size]
#   whctrs_ref : (4, T)      rows [width, height, ctr_x, ctr_y] (precomputed)
#   deltas_ref : (B*4, T)    rows [dx, dy, dw, dh] per batch element
#   scores_ref : (B, T)      foreground scores (padded lanes = -inf)
#   prop_ref   : (B*4, T)    output rows [x1, y1, x2, y2] per batch element
#   mscore_ref : (B, T)      scores with batch-0 keep mask applied (-inf = drop)
# -----------------------------------------------------------------------------
def _proposal_kernel(params_ref, whctrs_ref, deltas_ref, scores_ref,
                     prop_ref, mscore_ref):
    im_h = params_ref[0]
    im_w = params_ref[1]
    min_size = params_ref[2]

    wh = whctrs_ref[...]               # (4, T)
    d = deltas_ref[...]                # (B*4, T)
    s = scores_ref[...]                # (B, T)

    b4, t = d.shape
    row = jax.lax.broadcasted_iota(jnp.int32, (b4, t), 0)
    is_y = (row % 2) == 1              # dy/dh input rows; y1/y2 output rows
    is_hi = (row % 4) >= 2             # dw/dh input rows; x2/y2 output rows

    # per-row anchor geometry (sublane-broadcast from the 4 precomputed rows)
    size_a = jnp.where(is_y, wh[1:2, :], wh[0:1, :])   # width / height
    ctr_a = jnp.where(is_y, wh[3:4, :], wh[2:3, :])    # ctr_x / ctr_y

    # Align dx/dy and dw/dh to every output row with XLU sublane rotations
    # (replaces concat-of-slices, which materializes VMEM temporaries).
    d_dn = pltpu.roll(d, shift=2, axis=0)        # d_dn[r] = d[r-2]
    d_up = pltpu.roll(d, shift=b4 - 2, axis=0)   # d_up[r] = d[r+2]
    d_ctr = jnp.where(is_hi, d_dn, d)            # dx / dy on every row
    d_sz = jnp.where(is_hi, d, d_up)             # dw / dh on every row

    ctr_all = d_ctr * size_a + ctr_a             # pred_ctr_{x,y}
    ext_all = jnp.exp(d_sz) * (0.5 * size_a)     # 0.5 * pred_{w,h} (EUP)
    sign = jnp.where(is_hi, 1.0, -1.0)
    boxes = ctr_all + sign * ext_all             # [x1,y1,x2,y2] per batch

    # clip_boxes: one vectorized clamp, x rows vs [0, im_w-1], y rows vs [0, im_h-1]
    ub = jnp.where(is_y, im_h - 1.0, im_w - 1.0)
    boxes = jnp.clip(boxes, 0.0, ub)

    # _filter_boxes on batch 0; reference applies keep[0] to every batch element.
    ws = boxes[2:3, :] - boxes[0:1, :] + 1.0
    hs = boxes[3:4, :] - boxes[1:2, :] + 1.0
    keep0 = jnp.logical_and(ws >= min_size, hs >= min_size)   # (1, T)

    prop_ref[...] = boxes
    mscore_ref[...] = jnp.where(keep0, s, -jnp.inf)


# -----------------------------------------------------------------------------
# Greedy NMS on the (fixed-size) top-K candidates, in JAX glue.
# TODO(synk): top-k sort, dynamic boolean selection (proposals[:, keep[0], :])
#             and greedy NMS are data-dependent / dynamic-shape ops with no
#             clean Pallas equivalent; they are expressed in plain JAX using
#             -inf score masking + fixed-size buffers, matching the reference
#             output semantics.
# -----------------------------------------------------------------------------
def _nms_keep_mask(boxes, valid, thresh):
    x1, y1, x2, y2 = boxes[:, 0], boxes[:, 1], boxes[:, 2], boxes[:, 3]
    areas = (x2 - x1 + 1.0) * (y2 - y1 + 1.0)
    xx1 = jnp.maximum(x1[:, None], x1[None, :])
    yy1 = jnp.maximum(y1[:, None], y1[None, :])
    xx2 = jnp.minimum(x2[:, None], x2[None, :])
    yy2 = jnp.minimum(y2[:, None], y2[None, :])
    w = jnp.maximum(0.0, xx2 - xx1 + 1.0)
    h = jnp.maximum(0.0, yy2 - yy1 + 1.0)
    inter = w * h
    iou = inter / (areas[:, None] + areas[None, :] - inter)

    n = boxes.shape[0]

    def body(i, kept):
        suppressed = jnp.any(jnp.logical_and(kept, iou[i] > thresh))
        keep_i = jnp.logical_and(valid[i], jnp.logical_not(suppressed))
        return kept.at[i].set(keep_i)

    return jax.lax.fori_loop(0, n, body, jnp.zeros((n,), jnp.bool_))


# -----------------------------------------------------------------------------
# Tiling / static-data helpers (cached across calls).
# -----------------------------------------------------------------------------
def _multi_tensorcore_chip():
    # v7x has 2 TensorCores per chip; prefer >= 2 grid steps there so the
    # "parallel" grid axis has something to shard. Single largest tile on
    # v5e/v6e (1 TC) to minimize per-step overhead.
    try:
        kind = jax.devices()[0].device_kind.lower()
    except Exception:
        return False
    return "v7" in kind


def _choose_tiling(KA, max_lane_tile):
    ka128 = _round_up(KA, 128)
    tka = min(ka128, max_lane_tile)
    if _multi_tensorcore_chip() and ka128 >= 256:
        tka = min(tka, _round_up(pl.cdiv(ka128, 2), 128))
    ka_pad = _round_up(ka128, tka)
    return tka, ka_pad, ka_pad // tka


_WHCTRS_CACHE = {}


def _get_whctrs(H, W, stride, anchors_np, ka_pad):
    """Anchor geometry (w, h, ctr_x, ctr_y) as (4, ka_pad); cached + device-resident."""
    key = (int(H), int(W), int(stride), int(ka_pad), anchors_np.tobytes())
    cached = _WHCTRS_CACHE.get(key)
    if cached is not None:
        return cached
    A = anchors_np.shape[0]
    KA = H * W * A
    xs = np.arange(W, dtype=np.float32) * stride
    ys = np.arange(H, dtype=np.float32) * stride
    sx, sy = np.meshgrid(xs, ys)                       # k = j*W + i (reference order)
    shifts = np.stack([sx.ravel(), sy.ravel(), sx.ravel(), sy.ravel()], axis=1)
    fa = (anchors_np[None, :, :].astype(np.float32)
          + shifts[:, None, :].astype(np.float32)).reshape(KA, 4)
    widths = fa[:, 2] - fa[:, 0] + 1.0
    heights = fa[:, 3] - fa[:, 1] + 1.0
    whctrs = np.zeros((4, ka_pad), dtype=np.float32)
    whctrs[0, :KA] = widths
    whctrs[1, :KA] = heights
    whctrs[2, :KA] = fa[:, 0] + 0.5 * widths
    whctrs[3, :KA] = fa[:, 1] + 0.5 * heights
    whctrs = jax.device_put(jnp.asarray(whctrs))
    _WHCTRS_CACHE[key] = whctrs
    return whctrs


# -----------------------------------------------------------------------------
# Jitted forward (compiled once per static config; repack/pad fuse in XLA).
# -----------------------------------------------------------------------------
@functools.lru_cache(maxsize=None)
def _build_forward(B, A, H, W, tka, ka_pad, n_tiles,
                   pre_nms_topN, post_nms_topN, nms_thresh):
    KA = H * W * A

    def fwd(score, delta, params, whctrs):
        # --- foreground scores: (B, KA), padded lanes = -inf so they never rank ---
        scores_fg = score[:, A:, :, :]
        scores_flat = jnp.transpose(scores_fg, (0, 2, 3, 1)).reshape(B, KA).astype(jnp.float32)
        scores_pad = jnp.pad(scores_flat, ((0, 0), (0, ka_pad - KA)),
                             constant_values=-np.inf)

        # --- deltas: reference applies .view(B, -1, 4) to the *unpermuted* NCHW tensor ---
        # TODO(synk): ideal would be an in-kernel stride-4 de-interleave (or a
        # coordinate-major upstream layout) to remove this repack HBM pass; under
        # jit the transpose+pad at least fuse into a single pass.
        deltas_flat = delta.reshape(B, KA, 4).astype(jnp.float32)
        deltas_packed = jnp.transpose(deltas_flat, (0, 2, 1)).reshape(B * 4, KA)
        deltas_pad = jnp.pad(deltas_packed, ((0, 0), (0, ka_pad - KA)))

        prop_packed, masked_scores = pl.pallas_call(
            _proposal_kernel,
            out_shape=(jax.ShapeDtypeStruct((B * 4, ka_pad), jnp.float32),
                       jax.ShapeDtypeStruct((B, ka_pad), jnp.float32)),
            grid_spec=pltpu.PrefetchScalarGridSpec(
                num_scalar_prefetch=0,
                grid=(n_tiles,),
                in_specs=[
                    pl.BlockSpec(memory_space=pltpu.MemorySpace.SMEM),   # params
                    pl.BlockSpec((4, tka), lambda t: (0, t)),            # whctrs
                    pl.BlockSpec((B * 4, tka), lambda t: (0, t)),        # deltas
                    pl.BlockSpec((B, tka), lambda t: (0, t)),            # scores
                ],
                out_specs=[
                    pl.BlockSpec((B * 4, tka), lambda t: (0, t)),        # proposals
                    pl.BlockSpec((B, tka), lambda t: (0, t)),            # masked scores
                ],
            ),
            compiler_params=pltpu.CompilerParams(dimension_semantics=("parallel",)),
        )(params, whctrs, deltas_pad, scores_pad)

        proposals = prop_packed.reshape(B, 4, ka_pad)        # coordinate-major

        # rank by the keep-masked scores; filtered / padded boxes carry -inf
        # TODO(synk): at realistic KA (~1e5+) fuse a per-tile partial top-k into
        # the kernel (grid-carried scratch) and top_k only n_tiles*k candidates.
        top_scores, top_idx = jax.lax.top_k(masked_scores, pre_nms_topN)     # (B, topN)
        top_boxes = jnp.take_along_axis(proposals, top_idx[:, None, :], axis=2)
        top_boxes = jnp.transpose(top_boxes, (0, 2, 1))                      # (B,topN,4)
        top_valid = top_scores > -jnp.inf

        def per_batch(boxes, scs, valid):
            kept = _nms_keep_mask(boxes, valid, nms_thresh)        # (topN,) bool
            # post_nms_topN <= 0 in the reference config -> keep everything
            pos = jnp.cumsum(kept.astype(jnp.int32)) - 1
            rows = jnp.where(kept, pos, pre_nms_topN)              # dropped -> dummy row
            vals = jnp.concatenate([boxes, scs[:, None]], axis=1)  # (topN, 5)
            out = jnp.zeros((pre_nms_topN + 1, 5), jnp.float32).at[rows].set(vals)
            return out[:pre_nms_topN]

        return jax.vmap(per_batch)(top_boxes, top_scores, top_valid)

    return jax.jit(fwd)


# -----------------------------------------------------------------------------
# Full forward pass of proposal_layer.
# -----------------------------------------------------------------------------
def proposal_layer_forward(score, delta, img_hw, *, stride, anchors_np,
                           pre_nms_topN=PRE_NMS_TOPN, post_nms_topN=POST_NMS_TOPN,
                           nms_thresh=NMS_THRESH, min_size=RPN_MIN_SIZE,
                           max_lane_tile=8192):
    B = delta.shape[0]
    A = anchors_np.shape[0]
    H, W = score.shape[2], score.shape[3]
    KA = H * W * A

    tka, ka_pad, n_tiles = _choose_tiling(KA, max_lane_tile)
    whctrs = _get_whctrs(H, W, stride, anchors_np, ka_pad)

    # image size / min_size as SMEM scalars -> no recompile per image size
    params = jnp.asarray([float(img_hw[0]), float(img_hw[1]), float(min_size)],
                         dtype=jnp.float32)

    fwd = _build_forward(B, A, H, W, tka, ka_pad, n_tiles,
                         int(pre_nms_topN), int(post_nms_topN), float(nms_thresh))
    return fwd(score, delta, params, whctrs)                   # (B, pre_nms_topN, 5)


if __name__ == "__main__":
    # module config: stride, scales, ratios  (A = len(scales) * len(ratios) = 6)
    stride = 8
    scale = [8, 16]
    ratios = [0.5, 1, 2]
    anchors_np = generate_anchors(scales=np.array(scale), ratios=np.array(ratios))
    A = anchors_np.shape[0]

    B, H, W = 2, 8, 8
    key = jax.random.PRNGKey(0)
    k_score, k_delta = jax.random.split(key)
    score = jax.random.normal(k_score, (B, 2 * A, H, W), dtype=jnp.float32)
    delta = jax.random.normal(k_delta, (B, 4 * A, H, W), dtype=jnp.float32) * 0.2
    img = (float(H * stride), float(W * stride))    # (im_h, im_w)

    out = proposal_layer_forward(score, delta, img, stride=stride,
                                 anchors_np=anchors_np)
    out = jax.block_until_ready(out)
    assert out.shape == (B, PRE_NMS_TOPN, 5)
    assert bool(jnp.all(jnp.isfinite(out)))
    print("KERNEL_OK")
</pallas_src>

<mosaic_0001>
module attributes {stable_mosaic.version = 11 : i64} {
  func.func @_proposal_kernel(%arg0: i32, %arg1: memref<3xf32, #tpu.memory_space<smem>>, %arg2: memref<4x384xf32, #tpu.memory_space<vmem>>, %arg3: memref<8x384xf32, #tpu.memory_space<vmem>>, %arg4: memref<2x384xf32, #tpu.memory_space<vmem>>, %arg5: memref<8x384xf32, #tpu.memory_space<vmem>>, %arg6: memref<2x384xf32, #tpu.memory_space<vmem>>) attributes {dimension_semantics = [#tpu.dimension_semantics<parallel>], iteration_bounds = array<i64: 1>, scalar_prefetch = 0 : i64, scratch_operands = 0 : i64, tpu.core_type = #tpu.core_type<tc>, window_params = [{transform_indices = @transform_0, window_bounds = array<i64: 3>}, {transform_indices = @transform_1, window_bounds = array<i64: 4, 384>}, {transform_indices = @transform_2, window_bounds = array<i64: 8, 384>}, {transform_indices = @transform_3, window_bounds = array<i64: 2, 384>}, {transform_indices = @transform_4, window_bounds = array<i64: 8, 384>}, {transform_indices = @transform_5, window_bounds = array<i64: 2, 384>}]} {
    %c0 = arith.constant 0 : index
    %0 = memref.load %arg1[%c0] : memref<3xf32, #tpu.memory_space<smem>>
    %c1 = arith.constant 1 : index
    %1 = memref.load %arg1[%c1] : memref<3xf32, #tpu.memory_space<smem>>
    %c2 = arith.constant 2 : index
    %2 = memref.load %arg1[%c2] : memref<3xf32, #tpu.memory_space<smem>>
    %c0_0 = arith.constant 0 : index
    %c0_1 = arith.constant 0 : index
    %3 = vector.load %arg2[%c0_0, %c0_1] : memref<4x384xf32, #tpu.memory_space<vmem>>, vector<4x384xf32>
    %c0_2 = arith.constant 0 : index
    %c0_3 = arith.constant 0 : index
    %4 = vector.load %arg3[%c0_2, %c0_3] : memref<8x384xf32, #tpu.memory_space<vmem>>, vector<8x384xf32>
    %c0_4 = arith.constant 0 : index
    %c0_5 = arith.constant 0 : index
    %5 = vector.load %arg4[%c0_4, %c0_5] : memref<2x384xf32, #tpu.memory_space<vmem>>, vector<2x384xf32>
    %6 = tpu.iota {dimensions = array<i32: 0>} : vector<8x384xi32>
    %c2_i32 = arith.constant 2 : i32
    %c0_i32 = arith.constant 0 : i32
    %7 = arith.cmpi eq, %c2_i32, %c0_i32 : i32
    %c1_i32 = arith.constant 1 : i32
    %8 = arith.select %7, %c1_i32, %c2_i32 : i32
    %9 = vector.broadcast %8 : i32 to vector<8x384xi32>
    %10 = arith.remsi %6, %9 : vector<8x384xi32>
    %c0_i32_6 = arith.constant 0 : i32
    %11 = vector.broadcast %c0_i32_6 : i32 to vector<8x384xi32>
    %12 = arith.cmpi ne, %10, %11 : vector<8x384xi32>
    %c0_i32_7 = arith.constant 0 : i32
    %13 = vector.broadcast %c0_i32_7 : i32 to vector<8x384xi32>
    %14 = arith.cmpi slt, %10, %13 : vector<8x384xi32>
    %c0_i32_8 = arith.constant 0 : i32
    %15 = arith.cmpi slt, %8, %c0_i32_8 : i32
    %16 = vector.broadcast %15 : i1 to vector<8x384xi1>
    %17 = vector.broadcast %16 : vector<8x384xi1> to vector<8x384xi1>
    %18 = arith.xori %14, %17 : vector<8x384xi1>
    %19 = arith.andi %18, %12 : vector<8x384xi1>
    %20 = vector.broadcast %8 : i32 to vector<8x384xi32>
    %21 = arith.addi %10, %20 : vector<8x384xi32>
    %22 = arith.select %19, %21, %10 : vector<8x384xi1>, vector<8x384xi32>
    %c1_i32_9 = arith.constant 1 : i32
    %23 = vector.broadcast %c1_i32_9 : i32 to vector<8x384xi32>
    %24 = arith.cmpi eq, %22, %23 : vector<8x384xi32>
    %c4_i32 = arith.constant 4 : i32
    %c0_i32_10 = arith.constant 0 : i32
    %25 = arith.cmpi eq, %c4_i32, %c0_i32_10 : i32
    %c1_i32_11 = arith.constant 1 : i32
    %26 = arith.select %25, %c1_i32_11, %c4_i32 : i32
    %27 = vector.broadcast %26 : i32 to vector<8x384xi32>
    %28 = arith.remsi %6, %27 : vector<8x384xi32>
    %c0_i32_12 = arith.constant 0 : i32
    %29 = vector.broadcast %c0_i32_12 : i32 to vector<8x384xi32>
    %30 = arith.cmpi ne, %28, %29 : vector<8x384xi32>
    %c0_i32_13 = arith.constant 0 : i32
    %31 = vector.broadcast %c0_i32_13 : i32 to vector<8x384xi32>
    %32 = arith.cmpi slt, %28, %31 : vector<8x384xi32>
    %c0_i32_14 = arith.constant 0 : i32
    %33 = arith.cmpi slt, %26, %c0_i32_14 : i32
    %34 = vector.broadcast %33 : i1 to vector<8x384xi1>
    %35 = vector.broadcast %34 : vector<8x384xi1> to vector<8x384xi1>
    %36 = arith.xori %32, %35 : vector<8x384xi1>
    %37 = arith.andi %36, %30 : vector<8x384xi1>
    %38 = vector.broadcast %26 : i32 to vector<8x384xi32>
    %39 = arith.addi %28, %38 : vector<8x384xi32>
    %40 = arith.select %37, %39, %28 : vector<8x384xi1>, vector<8x384xi32>
    %c2_i32_15 = arith.constant 2 : i32
    %41 = vector.broadcast %c2_i32_15 : i32 to vector<8x384xi32>
    %42 = arith.cmpi sge, %40, %41 : vector<8x384xi32>
    %43 = vector.extract_strided_slice %3 {offsets = [1, 0], sizes = [1, 384], strides = [1, 1]} : vector<4x384xf32> to vector<1x384xf32>
    %44 = vector.extract_strided_slice %3 {offsets = [0, 0], sizes = [1, 384], strides = [1, 1]} : vector<4x384xf32> to vector<1x384xf32>
    %45 = vector.shape_cast %43 : vector<1x384xf32> to vector<1x384xf32>
    %46 = vector.broadcast %45 : vector<1x384xf32> to vector<8x384xf32>
    %47 = vector.shape_cast %44 : vector<1x384xf32> to vector<1x384xf32>
    %48 = vector.broadcast %47 : vector<1x384xf32> to vector<8x384xf32>
    %49 = arith.select %24, %46, %48 : vector<8x384xi1>, vector<8x384xf32>
    %50 = vector.extract_strided_slice %3 {offsets = [3, 0], sizes = [1, 384], strides = [1, 1]} : vector<4x384xf32> to vector<1x384xf32>
    %51 = vector.extract_strided_slice %3 {offsets = [2, 0], sizes = [1, 384], strides = [1, 1]} : vector<4x384xf32> to vector<1x384xf32>
    %52 = vector.shape_cast %50 : vector<1x384xf32> to vector<1x384xf32>
    %53 = vector.broadcast %52 : vector<1x384xf32> to vector<8x384xf32>
    %54 = vector.shape_cast %51 : vector<1x384xf32> to vector<1x384xf32>
    %55 = vector.broadcast %54 : vector<1x384xf32> to vector<8x384xf32>
    %56 = arith.select %24, %53, %55 : vector<8x384xi1>, vector<8x384xf32>
    %c2_i32_16 = arith.constant 2 : i32
    %57 = tpu.dynamic_rotate %4 by %c2_i32_16 dim 0 : vector<8x384xf32>, i32 -> vector<8x384xf32>
    %c6_i32 = arith.constant 6 : i32
    %58 = tpu.dynamic_rotate %4 by %c6_i32 dim 0 : vector<8x384xf32>, i32 -> vector<8x384xf32>
    %59 = arith.select %42, %57, %4 : vector<8x384xi1>, vector<8x384xf32>
    %60 = arith.select %42, %4, %58 : vector<8x384xi1>, vector<8x384xf32>
    %61 = arith.mulf %59, %49 : vector<8x384xf32>
    %62 = arith.addf %61, %56 : vector<8x384xf32>
    %63 = math.exp %60 : vector<8x384xf32>
    %cst = arith.constant 5.000000e-01 : f32
    %64 = vector.broadcast %cst : f32 to vector<8x384xf32>
    %65 = arith.mulf %64, %49 : vector<8x384xf32>
    %66 = arith.mulf %63, %65 : vector<8x384xf32>
    %cst_17 = arith.constant 1.000000e+00 : f32
    %cst_18 = arith.constant -1.000000e+00 : f32
    %67 = vector.broadcast %cst_17 : f32 to vector<8x384xf32>
    %68 = vector.broadcast %cst_18 : f32 to vector<8x384xf32>
    %69 = arith.select %42, %67, %68 : vector<8x384xi1>, vector<8x384xf32>
    %70 = arith.mulf %69, %66 : vector<8x384xf32>
    %71 = arith.addf %62, %70 : vector<8x384xf32>
    %cst_19 = arith.constant 1.000000e+00 : f32
    %72 = arith.subf %0, %cst_19 : f32
    %cst_20 = arith.constant 1.000000e+00 : f32
    %73 = arith.subf %1, %cst_20 : f32
    %74 = vector.broadcast %72 : f32 to vector<8x384xf32>
    %75 = vector.broadcast %73 : f32 to vector<8x384xf32>
    %76 = arith.select %24, %74, %75 : vector<8x384xi1>, vector<8x384xf32>
    %cst_21 = arith.constant 0.000000e+00 : f32
    %77 = vector.broadcast %cst_21 : f32 to vector<8x384xf32>
    %78 = arith.maximumf %77, %71 : vector<8x384xf32>
    %79 = arith.minimumf %76, %78 : vector<8x384xf32>
    %80 = vector.extract_strided_slice %79 {offsets = [2, 0], sizes = [1, 384], strides = [1, 1]} : vector<8x384xf32> to vector<1x384xf32>
    %81 = vector.extract_strided_slice %79 {offsets = [0, 0], sizes = [1, 384], strides = [1, 1]} : vector<8x384xf32> to vector<1x384xf32>
    %82 = arith.subf %80, %81 : vector<1x384xf32>
    %cst_22 = arith.constant 1.000000e+00 : f32
    %83 = vector.broadcast %cst_22 : f32 to vector<1x384xf32>
    %84 = arith.addf %82, %83 : vector<1x384xf32>
    %85 = vector.extract_strided_slice %79 {offsets = [3, 0], sizes = [1, 384], strides = [1, 1]} : vector<8x384xf32> to vector<1x384xf32>
    %86 = vector.extract_strided_slice %79 {offsets = [1, 0], sizes = [1, 384], strides = [1, 1]} : vector<8x384xf32> to vector<1x384xf32>
    %87 = arith.subf %85, %86 : vector<1x384xf32>
    %cst_23 = arith.constant 1.000000e+00 : f32
    %88 = vector.broadcast %cst_23 : f32 to vector<1x384xf32>
    %89 = arith.addf %87, %88 : vector<1x384xf32>
    %90 = vector.broadcast %2 : f32 to vector<1x384xf32>
    %91 = arith.cmpf oge, %84, %90 : vector<1x384xf32>
    %92 = vector.broadcast %2 : f32 to vector<1x384xf32>
    %93 = arith.cmpf oge, %89, %92 : vector<1x384xf32>
    %94 = arith.andi %91, %93 : vector<1x384xi1>
    %c0_24 = arith.constant 0 : index
    %c0_25 = arith.constant 0 : index
    %95 = vector.load %arg5[%c0_24, %c0_25] : memref<8x384xf32, #tpu.memory_space<vmem>>, vector<8x384xf32>
    tpu.vector_store %arg5[%c0_24, %c0_25], %79 {strides = array<i32>} : memref<8x384xf32, #tpu.memory_space<vmem>>, vector<8x384xf32>,
    %cst_26 = arith.constant 0xFF800000 : f32
    %96 = vector.shape_cast %94 : vector<1x384xi1> to vector<1x384xi1>
    %97 = vector.broadcast %96 : vector<1x384xi1> to vector<2x384xi1>
    %98 = vector.broadcast %cst_26 : f32 to vector<2x384xf32>
    %99 = arith.select %97, %5, %98 : vector<2x384xi1>, vector<2x384xf32>
    %c0_27 = arith.constant 0 : index
    %c0_28 = arith.constant 0 : index
    %100 = vector.load %arg6[%c0_27, %c0_28] : memref<2x384xf32, #tpu.memory_space<vmem>>, vector<2x384xf32>
    tpu.vector_store %arg6[%c0_27, %c0_28], %99 {strides = array<i32>} : memref<2x384xf32, #tpu.memory_space<vmem>>, vector<2x384xf32>,
    return
  }
  func.func @transform_0(%arg0: i32) -> i32 {
    %c0_i32 = arith.constant 0 : i32
    %c0_i32_0 = arith.constant 0 : i32
    return %c0_i32 : i32
  }
  func.func @transform_1(%arg0: i32) -> (i32, i32) {
    %c0_i32 = arith.constant 0 : i32
    %c0_i32_0 = arith.constant 0 : i32
    return %c0_i32, %arg0 : i32, i32
  }
  func.func @transform_2(%arg0: i32) -> (i32, i32) {
    %c0_i32 = arith.constant 0 : i32
    %c0_i32_0 = arith.constant 0 : i32
    return %c0_i32, %arg0 : i32, i32
  }
  func.func @transform_3(%arg0: i32) -> (i32, i32) {
    %c0_i32 = arith.constant 0 : i32
    %c0_i32_0 = arith.constant 0 : i32
    return %c0_i32, %arg0 : i32, i32
  }
  func.func @transform_4(%arg0: i32) -> (i32, i32) {
    %c0_i32 = arith.constant 0 : i32
    %c0_i32_0 = arith.constant 0 : i32
    return %c0_i32, %arg0 : i32, i32
  }
  func.func @transform_5(%arg0: i32) -> (i32, i32) {
    %c0_i32 = arith.constant 0 : i32
    %c0_i32_0 = arith.constant 0 : i32
    return %c0_i32, %arg0 : i32, i32
  }
}

</mosaic_0001>

<bundles_post_ra>
// kernel: fwd.1
= control target key start
LH: loop header
LB: loop body
LE: loop exit
PB: predicated region body
PF: predicated region fallthrough
CT: control target
= control target key end

     0   :  { %11 = vsyncpa [#allocation4], 0  ;;  %s410_s0 = inlined_call_operand.hbm [shape: f32[3], index: 0, kind: input, shape index: {}]   ;;  %s411_s1 = inlined_call_operand.hbm [shape: f32[4,384], index: 1, kind: input, shape index: {}]   ;;  %s412_s2 = inlined_call_operand.vmem [shape: f32[8,384], index: 2, kind: input, shape index: {}]   ;;  %s413_s3 = inlined_call_operand.vmem [shape: f32[2,384], index: 3, kind: input, shape index: {}]   ;;  %s414_s4 = inlined_call_operand.vmem [shape: f32[8,384], index: 4, kind: output, shape index: {0}]   ;;  %s415_s5 = inlined_call_operand.vmem [shape: f32[2,384], index: 5, kind: output, shape index: {1}]  }
   0x1   :  { %s18_s20 = sshll.u32 %s410_s0, 4  ;;  %s19_s20 = int_to_ptr.hbm [resolvable:$true] %s18_s20 }
   0x2   :  { %12 = vsyncpa [#allocation3], 0  ;;  %s27_s23 = sshll.u32 %s411_s1, 4  ;;  %s304_s24 = smov [#allocation2]   ;;  %s28_s23 = int_to_ptr.hbm [resolvable:$true] %s27_s23 }
   0x3   :  { %21 = dma.hbm_to_smem %s19_s20, 16, %s304_s24, [#allocation4]  }
   0x4   :  { %s305_s25 = smov [#allocation5]  }
   0x5   :  { %s29_s26 = sshll.u32 %s305_s25, 4  ;;  %s30_s26 = int_to_ptr.vmem [resolvable:$true] %s29_s26 }
   0x6   :  { %32 = dma.hbm_to_vmem [thread:$0]  %s28_s23, 192, %s30_s26, [#allocation3]  }
   0x7   :  { %300 = dma.done.wait [#allocation4], 16  }
   0x8   :  { %301 = vsyncadd [#allocation4], 4294967280 }
   0x9   :  { %302 = dma.done.wait [#allocation3], 192  }
   0xa   :  { %303 = vsyncadd [#allocation3], 4294967104 }
   0xb   :  { %45 = sfence }
   0xc   :  { %v54_v0 = vld [vmem:[%s413_s3] sm:$0x3f]  ;;  %v49_v1 = vld [vmem:[#allocation5] sm:$0xff]  ;;  %v55_v3 = vlaneseq  ;;  %s353_s3 = sld [smem:[#allocation2]]  ;;  %v50_v29 = vld [vmem:[#allocation5 + $0x8] sm:$0xf] }
   0xd   :  { %v51_v2 = vld [vmem:[%s412_s2] sm:$0xff]  ;;  %219 = vst [vmem:[#allocation1] ss:$4 sm:$0xff] %v54_v0  ;;  %v85_v4 = vperm.slane %v49_v1, 1  ;;  %v94_v6 = vperm.slane %v49_v1, 0  ;;  %v106_v7 = vperm.slane %v49_v1, 3 }
   0xe   :  { %v56_v5 = vshrl.u32 %v55_v3, 7  ;;  %v130_v8 = vrot.slane %v51_v2, 2  ;;  %v115_v11 = vperm.slane %v49_v1, 2  ;;  %v127_v12 = vrot.slane %v51_v2, 6  ;;  %v52_v13 = vld [vmem:[%s412_s2 + $0x8] sm:$0xff]  ;;  %s359_s6 = sld [smem:[#allocation2 + $0x1]] }
   0xf   :  { %v91_v14 = vperm.slane %v85_v4, 1  ;;  %v100_v16 = vperm.slane %v94_v6, 0  ;;  %v86_v17 = vperm.slane %v49_v1, 5  ;;  %v95_v18 = vperm.slane %v49_v1, 4  ;;  %v53_v37 = vld [vmem:[%s412_s2 + $0x10] sm:$0xff]  ;;  %s251_s2 = sld [smem:[#allocation2 + $0x2]] }
  0x10   :  { %v61_v9 = vand.u32 1, %v56_v5  ;;  %v74_v10 = vand.u32 3, %v56_v5  ;;  %v131_v21 = vrot.slane %v52_v13, 2  ;;  %v112_v22 = vperm.slane %v106_v7, 3 }
  0x11   :  { %v121_v23 = vperm.slane %v115_v11, 2  ;;  %v107_v26 = vperm.slane %v49_v1, 7  ;;  %v116_v27 = vperm.slane %v49_v1, 6  ;;  %v128_v28 = vrot.slane %v52_v13, 6 }
  0x12   :  { %vm355_vm0 = vcmp.ge.s32.totalorder %v74_v10, 2  ;;  %vm361_vm1 = vcmp.eq.s32.totalorder %v61_v9, 1  ;;  %v92_v31 = vperm.slane %v86_v17, 1  ;;  %v101_v32 = vperm.slane %v95_v18, 0  ;;  %s252_s9 = sadd.f32 -1.0, %s353_s3 }
  0x13   :  { %v136_v20 = vsel %vm355_vm0, %v51_v2, %v130_v8  ;;  %v133_v24 = vsel %vm355_vm0, %v127_v12, %v51_v2  ;;  %v103_v30 = vsel %vm361_vm1, %v91_v14, %v100_v16  ;;  %v137_v34 = vsel %vm355_vm0, %v52_v13, %v131_v21 }
  0x14   :  { %v145_v25 = vmul.f32 1.442695, %v136_v20  ;;  %v139_v33 = vmul.f32 %v133_v24, %v103_v30  ;;  %v124_v35 = vsel %vm361_vm1, %v112_v22, %v121_v23  ;;  %v147_v36 = vmul.f32 1.442695, %v137_v34  ;;  %s253_s10 = sadd.f32 -1.0, %s359_s6 }
  0x15   :  { %v87_v38 = vperm.slane %v50_v29, 1  ;;  %v151_v39 = vmul.f32 0.5, %v103_v30  ;;  %v113_v40 = vperm.slane %v107_v26, 3  ;;  %v96_v41 = vperm.slane %v50_v29, 0 }
  0x16   :  { %258 = vpow2.f32 %v145_v25  ;;  %v104_v42 = vsel %vm361_vm1, %v92_v31, %v101_v32  ;;  %v122_v43 = vperm.slane %v116_v27, 2  ;;  %v134_v44 = vsel %vm355_vm0, %v128_v28, %v52_v13 }
  0x17   :  { %260 = vpow2.f32 %v147_v36  ;;  %v142_v45 = vadd.f32 %v139_v33, %v124_v35  ;;  %v306_v46 = vmov -1.0   ;;  %v108_v48 = vperm.slane %v50_v29, 3 }
  0x18   :  { %v157_v47 = vsel %vm355_vm0, 1.0, %v306_v46  ;;  %v132_v49 = vrot.slane %v53_v37, 2  ;;  %v93_v51 = vperm.slane %v87_v38, 1  ;;  %v102_v52 = vperm.slane %v96_v41, 0 }
  0x19   :  { %v117_v53 = vperm.slane %v50_v29, 2  ;;  %v129_v54 = vrot.slane %v53_v37, 6  ;;  %v140_v56 = vmul.f32 %v134_v44, %v104_v42  ;;  %v152_v57 = vmul.f32 0.5, %v104_v42  ;;  %v221_v44 = vld.sshfl [vmem:[#allocation1 + $0x8] sm:$0xff pattern:$0x73625140] }
  0x1a   :  { %v138_v58 = vsel %vm355_vm0, %v53_v37, %v132_v49  ;;  %v125_v59 = vsel %vm361_vm1, %v113_v40, %v122_v43  ;;  %v166_v62 = vstv %s252_s9  ;;  %v167_v63 = vstv %s253_s10  ;;  %v220_v49 = vld.sshfl [vmem:[#allocation1] sm:$0xff pattern:$0x73625140] }
  0x1b   :  { %v149_v60 = vmul.f32 1.442695, %v138_v58  ;;  %v114_v0 = vperm.slane %v108_v48, 3  ;;  %v105_v2 = vsel %vm361_vm1, %v93_v51, %v102_v52  ;;  %v123_v3 = vperm.slane %v117_v53, 2 }
  0x1c   :  { %v259_v50 = vpop.eup %258  ;;  %v135_v4 = vsel %vm355_vm0, %v129_v54, %v53_v37  ;;  %v143_v6 = vadd.f32 %v140_v56, %v125_v59  ;;  %v168_v8 = vsel %vm361_vm1, %v166_v62, %v167_v63  ;;  %v153_v12 = vmul.f32 0.5, %v105_v2  ;;  %v222_v52 = vld.sshfl [vmem:[#allocation1 + $0x10] sm:$0xff pattern:$0x73625140] }
  0x1d   :  { %v154_v55 = vmul.f32 %v259_v50, %v151_v39  ;;  %v261_v1 = vpop.eup %260  ;;  %262 = vpow2.f32 %v149_v60  ;;  %v141_v11 = vmul.f32 %v135_v4, %v105_v2  ;;  %v126_v13 = vsel %vm361_vm1, %v114_v0, %v123_v3 }
  0x1e   :  { %v155_v7 = vmul.f32 %v261_v1, %v152_v57  ;;  %v190_v25 = vstv %s251_s2  ;;  %v307_v30 = vmov 0   ;;  %vm234_vm13 = vcmask 1041408  }
  0x1f   :  { %v158_v61 = vmul.f32 %v157_v47, %v154_v55  ;;  %v144_v20 = vadd.f32 %v141_v11, %v126_v13  ;;  %vm236_vm15 = vcmask 1043456  }
  0x20   :  { %v159_v10 = vmul.f32 %v157_v47, %v155_v7 }
  0x21   :  { %v161_v5 = vadd.f32 %v158_v61, %v142_v45 }
  0x22   :  { %v162_v16 = vadd.f32 %v159_v10, %v143_v6 }
  0x23   :  { %v169_v9 = vmax.f32 %v161_v5, 0.0  ;;  %v263_v17 = vpop.eup %262 }
  0x24   :  { %v170_v18 = vmax.f32 %v162_v16, 0.0  ;;  %v156_v21 = vmul.f32 %v263_v17, %v153_v12 }
  0x25   :  { %v172_v14 = vmin.f32 %v168_v8, %v169_v9 }
  0x26   :  { %v173_v23 = vmin.f32 %v168_v8, %v170_v18  ;;  %v160_v24 = vmul.f32 %v157_v47, %v156_v21 }
  0x27   :  { %v178_v15 = vrot.slane %v172_v14, 6  ;;  %206 = vst [vmem:[%s414_s4] sm:$0xff] %v172_v14 }
  0x28   :  { %v179_v27 = vrot.slane %v173_v23, 6  ;;  %207 = vst [vmem:[%s414_s4 + $0x8] sm:$0xff] %v173_v23  ;;  %v163_v19 = vadd.f32 %v160_v24, %v144_v20 }
  0x29   :  { %v184_v22 = vsub.f32 %v172_v14, %v178_v15 }
  0x2a   :  { %v185_v28 = vsub.f32 %v173_v23, %v179_v27  ;;  %v171_v29 = vmax.f32 %v163_v19, 0.0 }
  0x2b   :  { %v187_v26 = vadd.f32 1.0, %v184_v22 }
  0x2c   :  { %v188_v32 = vadd.f32 1.0, %v185_v28  ;;  %v174_v33 = vmin.f32 %v168_v8, %v171_v29 }
  0x2d   :  { %vm191_vm2 = vcmp.ge.f32.partialorder %v187_v26, %v190_v25 }
  0x2e   :  { %v194_v31 = vsel %vm191_vm2, 1, %v307_v30  ;;  %v180_v35 = vrot.slane %v174_v33, 6  ;;  %208 = vst [vmem:[%s414_s4 + $0x10] sm:$0xff] %v174_v33  ;;  %vm192_vm3 = vcmp.ge.f32.partialorder %v188_v32, %v190_v25 }
  0x2f   :  { %v197_v34 = vrot.slane %v194_v31, 1  ;;  %v195_v36 = vsel %vm192_vm3, 1, %v307_v30 }
  0x30   :  { %v186_v37 = vsub.f32 %v174_v33, %v180_v35  ;;  %v198_v38 = vrot.slane %v195_v36, 1 }
  0x31   :  { %vm200_vm4 = vcmp.ne.s32.totalorder %v197_v34, 0 }
  0x32   :  { %vm203_vm5 = vmand %vm191_vm2, %vm200_vm4  ;;  %v189_v39 = vadd.f32 1.0, %v186_v37  ;;  %vm201_vm6 = vcmp.ne.s32.totalorder %v198_v38, 0 }
  0x33   :  { %vm204_vm7 = vmand %vm192_vm3, %vm201_vm6  ;;  %v209_v40 = vsel %vm203_vm5, 1, %v307_v30 }
  0x34   :  { %vm193_vm8 = vcmp.ge.f32.partialorder %v189_v39, %v190_v25  ;;  %v210_v41 = vsel %vm204_vm7, 1, %v307_v30  ;;  %v212_v46 = vperm.slane %v209_v40, 2 }
  0x35   :  { %v196_v42 = vsel %vm193_vm8, 1, %v307_v30  ;;  %v213_v43 = vperm.slane %v210_v41, 2 }
  0x36   :  { %v199_v45 = vrot.slane %v196_v42, 1  ;;  %vm215_vm12 = vcmp.eq.s32.totalorder %v212_v46, 1 }
  0x37   :  { %vm216_vm9 = vcmp.eq.s32.totalorder %v213_v43, 1  ;;  %v226_v53 = vsel %vm215_vm12, %v220_v49, -inf }
  0x38   :  { %vm202_vm10 = vcmp.ne.s32.totalorder %v199_v45, 0  ;;  %v227_v47 = vsel %vm216_vm9, %v221_v44, -inf }
  0x39   :  { %vm205_vm11 = vmand %vm193_vm8, %vm202_vm10  ;;  %v232_v50 = vrot.slane %v227_v47, 6 }
  0x3a   :  { %v211_v48 = vsel %vm205_vm11, 1, %v307_v30 }
  0x3b   :  { %v214_v51 = vperm.slane %v211_v48, 2  ;;  %v235_v55 = vsel %vm234_vm13, %v226_v53, %v232_v50 }
  0x3d   :  { %vm217_vm14 = vcmp.eq.s32.totalorder %v214_v51, 1 }
  0x3e   :  { %v228_v54 = vsel %vm217_vm14, %v222_v52, -inf }
  0x3f   :  { %v233_v56 = vrot.slane %v228_v54, 4 }
  0x41   :  { %v237_v57 = vsel %vm236_vm15, %v235_v55, %v233_v56 }
  0x42   :  { %239 = vst [vmem:[%s415_s5] sm:$0x3f] %v237_v57 }
  0x43   :  { %248 = vsyncpa [#allocation3], 1 }
  0x44   :  { %249 = vsyncpa [#allocation4], 1 }

</bundles_post_ra>
